<compile_context>
chip_gen: v5e
topology: v5e:2x2
jax: 0.10.0
libtpu: 0.0.40
codegen_flags: <defaults>
</compile_context>

<pallas_src>
import functools

import jax
import jax.numpy as jnp
from jax.experimental import pallas as pl
from jax.experimental.pallas import tpu as pltpu


def _loss_kernel(*refs, n_batch, n_chan, n_spatial, ksize, dice_ratio, full_cover):
    if full_cover:
        logits_ref, labels_ref, out_ref = refs
    else:
        logits_ref, labels_ref, band_ref, out_ref = refs

    inv_k2 = 1.0 / float(ksize * ksize)
    spatial_f = float(n_spatial)

    z = logits_ref[...].astype(jnp.float32)   # (N*C, H*W), upcast in-kernel
    t = labels_ref[...].astype(jnp.float32)   # (N*C, H*W)

    # ---- stable sigmoid + BCE: one exp, one log, one reciprocal per element ----
    e = jnp.exp(-jnp.abs(z))
    log1pe = jnp.log(1.0 + e)
    inv1pe = 1.0 / (1.0 + e)
    p = jnp.where(z >= 0.0, inv1pe, e * inv1pe)           # sigmoid(z), stable
    f = jnp.maximum(z, 0.0) - z * t + log1pe              # elementwise BCE

    sum_t = jnp.sum(t, axis=1, keepdims=True)             # (N*C, 1)

    if full_cover:
        # Pooling window covers the whole image: pooled value (and hence the border
        # weight) is a per-(n,c) scalar. Fold it into per-row sums; never build maps.
        pooled = sum_t * inv_k2                            # (N*C, 1)
        ind = jnp.logical_and(pooled >= 0.01, pooled <= 0.99).astype(jnp.float32)
        rw = 1.0 + 2.0 * ind                               # (N*C, 1), unscaled weight
        rw2 = rw * rw
        bce_rows = rw * jnp.sum(f, axis=1, keepdims=True)          # sum(rw*f) per row
        w1_rows = rw * spatial_f                                    # sum(rw)   per row
        inter_rows = rw2 * jnp.sum(p * t, axis=1, keepdims=True)
        s1_rows = rw2 * jnp.sum(p, axis=1, keepdims=True)
        s2_rows = rw2 * sum_t
    else:
        # Batched stride-1 box pooling of all N*C images in one bf16 MXU matmul
        # (0/1 operands, f32 accumulation -> pooled counts are exact).
        pooled = jnp.dot(t.astype(jnp.bfloat16), band_ref[...],
                         preferred_element_type=jnp.float32) * inv_k2
        ind = jnp.logical_and(pooled >= 0.01, pooled <= 0.99).astype(jnp.float32)
        rw = 1.0 + 2.0 * ind                               # (N*C, H*W)
        rw2 = rw * rw
        wp = rw2 * p
        bce_rows = jnp.sum(rw * f, axis=1, keepdims=True)
        w1_rows = jnp.sum(rw, axis=1, keepdims=True)
        inter_rows = jnp.sum(wp * t, axis=1, keepdims=True)
        s1_rows = jnp.sum(wp, axis=1, keepdims=True)
        s2_rows = jnp.sum(rw2 * t, axis=1, keepdims=True)

    # ---- finalize: global rescale scale = w0/w1 cancels in BCE, enters Dice as scale^2 ----
    w1 = jnp.sum(w1_rows, keepdims=True)                   # (1, 1)
    bce = jnp.sum(bce_rows, keepdims=True) / w1            # (1, 1)
    w0 = float(n_batch * n_chan) * spatial_f               # sum of the all-ones weights
    scale = w0 / w1
    scale2 = scale * scale

    dice_sum = jnp.zeros((1, 1), jnp.float32)
    for n in range(n_batch):                               # static unroll over samples
        lo, hi = n * n_chan, (n + 1) * n_chan
        inter_n = jnp.sum(inter_rows[lo:hi], keepdims=True)
        s12_n = jnp.sum(s1_rows[lo:hi] + s2_rows[lo:hi], keepdims=True)
        dice_sum = dice_sum + 2.0 * (scale2 * inter_n + 1.0) / (scale2 * s12_n + 1.0)
    dice = 1.0 - dice_sum / float(n_batch)

    bce_w = (1.0 - dice_ratio) / 0.5
    dice_w = dice_ratio / 0.5
    out_ref[...] = bce_w * bce + dice_w * dice


def bce_dice_penalize_border_loss(logits, labels, kernel_size=55, dice_ratio=0.5):
    """JAX wrapper. logits/labels: (N, C, H, W). Returns scalar f32 loss."""
    N, C, H, W = logits.shape
    R, L = N * C, H * W
    pad = kernel_size // 2
    full_cover = (pad >= H - 1) and (pad >= W - 1)

    # Lane-dense (N*C, H*W) slabs; inputs stay in native dtype (upcast in-kernel).
    args = [logits.reshape(R, L), labels.reshape(R, L)]
    if not full_cover:
        # (H*W, H*W) band matrix implementing the stride-1, zero-padded,
        # count_include_pad box sum as one matmul. 0/1 entries -> bf16 is exact
        # with f32 MXU accumulation.
        # TODO(synk): for large H*W use a separable roll-based box filter instead of
        # this O((H*W)^2) kron band matrix.
        ih = jnp.arange(H)
        iw = jnp.arange(W)
        band_h = (jnp.abs(ih[:, None] - ih[None, :]) <= pad).astype(jnp.bfloat16)
        band_w = (jnp.abs(iw[:, None] - iw[None, :]) <= pad).astype(jnp.bfloat16)
        args.append(jnp.kron(band_h, band_w))

    kernel = functools.partial(
        _loss_kernel, n_batch=N, n_chan=C, n_spatial=L, ksize=kernel_size,
        dice_ratio=dice_ratio, full_cover=full_cover)

    matmul_flops = 0 if full_cover else 2 * R * L * L
    cost = pl.CostEstimate(
        flops=int(matmul_flops + 30 * R * L),
        transcendentals=int(3 * R * L),
        bytes_accessed=int(sum(int(a.size) * a.dtype.itemsize for a in args) + 4))

    out = pl.pallas_call(
        kernel,
        out_shape=jax.ShapeDtypeStruct((1, 1), jnp.float32),
        in_specs=[pl.BlockSpec(memory_space=pltpu.MemorySpace.VMEM)] * len(args),
        out_specs=pl.BlockSpec(memory_space=pltpu.MemorySpace.VMEM),
        cost_estimate=cost,
    )(*args)
    return out[0, 0]


def _reference(logits, labels, kernel_size=55, dice_ratio=0.5):
    """Pure-JAX reference mirroring the PyTorch module (sanity check)."""
    N = logits.shape[0]
    pad = kernel_size // 2
    a = jax.lax.reduce_window(
        labels, 0.0, jax.lax.add,
        window_dimensions=(1, 1, kernel_size, kernel_size),
        window_strides=(1, 1, 1, 1),
        padding=[(0, 0), (0, 0), (pad, pad), (pad, pad)]) / float(kernel_size ** 2)
    ind = (jnp.logical_and(a >= 0.01, a <= 0.99)).astype(jnp.float32)
    weights = jnp.ones_like(a)
    w0 = jnp.sum(weights)
    weights = weights + ind * 2.0
    w1 = jnp.sum(weights)
    weights = weights / w1 * w0
    # BCE
    w = weights.reshape(-1)
    z = logits.reshape(-1)
    t = labels.reshape(-1)
    bce = jnp.sum(w * jnp.maximum(z, 0.0) - w * z * t
                  + w * jnp.log(1.0 + jnp.exp(-jnp.abs(z)))) / jnp.sum(w)
    # Dice
    probs = jax.nn.sigmoid(logits)
    wn = weights.reshape(N, -1)
    w2 = wn * wn
    m1 = probs.reshape(N, -1)
    m2 = labels.reshape(N, -1)
    score = 2.0 * ((w2 * m1 * m2).sum(1) + 1.0) / ((w2 * m1).sum(1) + (w2 * m2).sum(1) + 1.0)
    dice = 1.0 - score.sum() / N
    return ((1.0 - dice_ratio) / 0.5) * bce + (dice_ratio / 0.5) * dice


if __name__ == "__main__":
    key = jax.random.PRNGKey(0)
    k1, k2 = jax.random.split(key)
    N, C, H, W = 2, 4, 16, 16
    logits = 2.0 * jax.random.normal(k1, (N, C, H, W), dtype=jnp.float32)
    labels = (jax.random.uniform(k2, (N, C, H, W)) > 0.5).astype(jnp.float32)

    # Default config: pooling window covers the whole image (scalar-weight fast path).
    loss = bce_dice_penalize_border_loss(logits, labels, kernel_size=55, dice_ratio=0.5)
    jax.block_until_ready(loss)
    ref = _reference(logits, labels, kernel_size=55, dice_ratio=0.5)
    assert jnp.allclose(loss, ref, rtol=1e-4, atol=1e-4), (loss, ref)

    # Small pooling kernel: exercises the batched bf16 band-matmul pooling path.
    loss2 = bce_dice_penalize_border_loss(logits, labels, kernel_size=5, dice_ratio=0.5)
    jax.block_until_ready(loss2)
    ref2 = _reference(logits, labels, kernel_size=5, dice_ratio=0.5)
    assert jnp.allclose(loss2, ref2, rtol=1e-4, atol=1e-4), (loss2, ref2)

    print("KERNEL_OK")
</pallas_src>

<mosaic_0001>
module attributes {stable_mosaic.version = 11 : i64} {
  func.func @_loss_kernel(%arg0: memref<8x256xf32, #tpu.memory_space<vmem>>, %arg1: memref<8x256xf32, #tpu.memory_space<vmem>>, %arg2: memref<1x1xf32, #tpu.memory_space<vmem>>) attributes {dimension_semantics = [], scalar_prefetch = 0 : i64, scratch_operands = 0 : i64, tpu.core_type = #tpu.core_type<tc>} {
    %c0 = arith.constant 0 : index
    %c0_0 = arith.constant 0 : index
    %0 = vector.load %arg0[%c0, %c0_0] : memref<8x256xf32, #tpu.memory_space<vmem>>, vector<8x256xf32>
    %c0_1 = arith.constant 0 : index
    %c0_2 = arith.constant 0 : index
    %1 = vector.load %arg1[%c0_1, %c0_2] : memref<8x256xf32, #tpu.memory_space<vmem>>, vector<8x256xf32>
    %2 = math.absf %0 : vector<8x256xf32>
    %cst = arith.constant 0.000000e+00 : f32
    %3 = vector.broadcast %cst : f32 to vector<8x256xf32>
    %4 = arith.subf %3, %2 : vector<8x256xf32>
    %5 = math.exp %4 : vector<8x256xf32>
    %cst_3 = arith.constant 1.000000e+00 : f32
    %6 = vector.broadcast %cst_3 : f32 to vector<8x256xf32>
    %7 = arith.addf %6, %5 : vector<8x256xf32>
    %8 = math.log %7 : vector<8x256xf32>
    %cst_4 = arith.constant 1.000000e+00 : f32
    %9 = vector.broadcast %cst_4 : f32 to vector<8x256xf32>
    %10 = arith.addf %9, %5 : vector<8x256xf32>
    %cst_5 = arith.constant 1.000000e+00 : f32
    %11 = vector.broadcast %cst_5 : f32 to vector<8x256xf32>
    %12 = arith.divf %11, %10 : vector<8x256xf32>
    %cst_6 = arith.constant 0.000000e+00 : f32
    %13 = vector.broadcast %cst_6 : f32 to vector<8x256xf32>
    %14 = arith.cmpf oge, %0, %13 : vector<8x256xf32>
    %15 = arith.mulf %5, %12 : vector<8x256xf32>
    %16 = arith.select %14, %12, %15 : vector<8x256xi1>, vector<8x256xf32>
    %cst_7 = arith.constant 0.000000e+00 : f32
    %17 = vector.broadcast %cst_7 : f32 to vector<8x256xf32>
    %18 = arith.maximumf %0, %17 : vector<8x256xf32>
    %19 = arith.mulf %0, %1 : vector<8x256xf32>
    %20 = arith.subf %18, %19 : vector<8x256xf32>
    %21 = arith.addf %20, %8 : vector<8x256xf32>
    %cst_8 = arith.constant dense<0.000000e+00> : vector<8xf32>
    %22 = vector.multi_reduction <add>, %1, %cst_8 [1] : vector<8x256xf32> to vector<8xf32>
    %23 = vector.shape_cast %22 : vector<8xf32> to vector<8x1xf32>
    %cst_9 = arith.constant 3.30578507E-4 : f32
    %24 = vector.broadcast %cst_9 : f32 to vector<8x1xf32>
    %25 = arith.mulf %23, %24 : vector<8x1xf32>
    %cst_10 = arith.constant 0.00999999977 : f32
    %26 = vector.broadcast %cst_10 : f32 to vector<8x1xf32>
    %27 = arith.cmpf oge, %25, %26 : vector<8x1xf32>
    %cst_11 = arith.constant 9.900000e-01 : f32
    %28 = vector.broadcast %cst_11 : f32 to vector<8x1xf32>
    %29 = arith.cmpf ole, %25, %28 : vector<8x1xf32>
    %30 = arith.andi %27, %29 : vector<8x1xi1>
    %31 = arith.extui %30 : vector<8x1xi1> to vector<8x1xi32>
    %32 = arith.sitofp %31 : vector<8x1xi32> to vector<8x1xf32>
    %cst_12 = arith.constant 2.000000e+00 : f32
    %33 = vector.broadcast %cst_12 : f32 to vector<8x1xf32>
    %34 = arith.mulf %33, %32 : vector<8x1xf32>
    %cst_13 = arith.constant 1.000000e+00 : f32
    %35 = vector.broadcast %cst_13 : f32 to vector<8x1xf32>
    %36 = arith.addf %35, %34 : vector<8x1xf32>
    %37 = arith.mulf %36, %36 : vector<8x1xf32>
    %cst_14 = arith.constant dense<0.000000e+00> : vector<8xf32>
    %38 = vector.multi_reduction <add>, %21, %cst_14 [1] : vector<8x256xf32> to vector<8xf32>
    %39 = vector.shape_cast %38 : vector<8xf32> to vector<8x1xf32>
    %40 = arith.mulf %36, %39 : vector<8x1xf32>
    %cst_15 = arith.constant 2.560000e+02 : f32
    %41 = vector.broadcast %cst_15 : f32 to vector<8x1xf32>
    %42 = arith.mulf %36, %41 : vector<8x1xf32>
    %43 = arith.mulf %16, %1 : vector<8x256xf32>
    %cst_16 = arith.constant dense<0.000000e+00> : vector<8xf32>
    %44 = vector.multi_reduction <add>, %43, %cst_16 [1] : vector<8x256xf32> to vector<8xf32>
    %45 = vector.shape_cast %44 : vector<8xf32> to vector<8x1xf32>
    %46 = arith.mulf %37, %45 : vector<8x1xf32>
    %cst_17 = arith.constant dense<0.000000e+00> : vector<8xf32>
    %47 = vector.multi_reduction <add>, %16, %cst_17 [1] : vector<8x256xf32> to vector<8xf32>
    %48 = vector.shape_cast %47 : vector<8xf32> to vector<8x1xf32>
    %49 = arith.mulf %37, %48 : vector<8x1xf32>
    %50 = arith.mulf %37, %23 : vector<8x1xf32>
    %51 = vector.shape_cast %42 : vector<8x1xf32> to vector<1x8x1xf32>
    %cst_18 = arith.constant dense<0.000000e+00> : vector<1xf32>
    %52 = vector.multi_reduction <add>, %51, %cst_18 [1, 2] : vector<1x8x1xf32> to vector<1xf32>
    %53 = vector.shape_cast %52 : vector<1xf32> to vector<1x1x1xf32>
    %54 = vector.extract %53[0, 0, 0] : f32 from vector<1x1x1xf32>
    %55 = vector.broadcast %54 : f32 to vector<1x1xf32>
    %56 = vector.shape_cast %40 : vector<8x1xf32> to vector<1x8x1xf32>
    %cst_19 = arith.constant dense<0.000000e+00> : vector<1xf32>
    %57 = vector.multi_reduction <add>, %56, %cst_19 [1, 2] : vector<1x8x1xf32> to vector<1xf32>
    %58 = vector.shape_cast %57 : vector<1xf32> to vector<1x1x1xf32>
    %59 = vector.extract %58[0, 0, 0] : f32 from vector<1x1x1xf32>
    %60 = vector.broadcast %59 : f32 to vector<1x1xf32>
    %61 = arith.divf %60, %55 : vector<1x1xf32>
    %cst_20 = arith.constant 2.048000e+03 : f32
    %62 = vector.broadcast %cst_20 : f32 to vector<1x1xf32>
    %63 = arith.divf %62, %55 : vector<1x1xf32>
    %64 = arith.mulf %63, %63 : vector<1x1xf32>
    %cst_21 = arith.constant 0.000000e+00 : f32
    %65 = vector.broadcast %cst_21 : f32 to vector<1x1xf32>
    %66 = vector.extract_strided_slice %46 {offsets = [0, 0], sizes = [4, 1], strides = [1, 1]} : vector<8x1xf32> to vector<4x1xf32>
    %67 = vector.shape_cast %66 : vector<4x1xf32> to vector<1x4x1xf32>
    %cst_22 = arith.constant dense<0.000000e+00> : vector<1xf32>
    %68 = vector.multi_reduction <add>, %67, %cst_22 [1, 2] : vector<1x4x1xf32> to vector<1xf32>
    %69 = vector.shape_cast %68 : vector<1xf32> to vector<1x1x1xf32>
    %70 = vector.extract %69[0, 0, 0] : f32 from vector<1x1x1xf32>
    %71 = vector.broadcast %70 : f32 to vector<1x1xf32>
    %72 = vector.extract_strided_slice %49 {offsets = [0, 0], sizes = [4, 1], strides = [1, 1]} : vector<8x1xf32> to vector<4x1xf32>
    %73 = vector.extract_strided_slice %50 {offsets = [0, 0], sizes = [4, 1], strides = [1, 1]} : vector<8x1xf32> to vector<4x1xf32>
    %74 = arith.addf %72, %73 : vector<4x1xf32>
    %75 = vector.shape_cast %74 : vector<4x1xf32> to vector<1x4x1xf32>
    %cst_23 = arith.constant dense<0.000000e+00> : vector<1xf32>
    %76 = vector.multi_reduction <add>, %75, %cst_23 [1, 2] : vector<1x4x1xf32> to vector<1xf32>
    %77 = vector.shape_cast %76 : vector<1xf32> to vector<1x1x1xf32>
    %78 = vector.extract %77[0, 0, 0] : f32 from vector<1x1x1xf32>
    %79 = vector.broadcast %78 : f32 to vector<1x1xf32>
    %80 = arith.mulf %64, %71 : vector<1x1xf32>
    %cst_24 = arith.constant 1.000000e+00 : f32
    %81 = vector.broadcast %cst_24 : f32 to vector<1x1xf32>
    %82 = arith.addf %80, %81 : vector<1x1xf32>
    %cst_25 = arith.constant 2.000000e+00 : f32
    %83 = vector.broadcast %cst_25 : f32 to vector<1x1xf32>
    %84 = arith.mulf %83, %82 : vector<1x1xf32>
    %85 = arith.mulf %64, %79 : vector<1x1xf32>
    %cst_26 = arith.constant 1.000000e+00 : f32
    %86 = vector.broadcast %cst_26 : f32 to vector<1x1xf32>
    %87 = arith.addf %85, %86 : vector<1x1xf32>
    %88 = arith.divf %84, %87 : vector<1x1xf32>
    %89 = arith.addf %65, %88 : vector<1x1xf32>
    %90 = vector.extract_strided_slice %46 {offsets = [4, 0], sizes = [4, 1], strides = [1, 1]} : vector<8x1xf32> to vector<4x1xf32>
    %91 = vector.shape_cast %90 : vector<4x1xf32> to vector<1x4x1xf32>
    %cst_27 = arith.constant dense<0.000000e+00> : vector<1xf32>
    %92 = vector.multi_reduction <add>, %91, %cst_27 [1, 2] : vector<1x4x1xf32> to vector<1xf32>
    %93 = vector.shape_cast %92 : vector<1xf32> to vector<1x1x1xf32>
    %94 = vector.extract %93[0, 0, 0] : f32 from vector<1x1x1xf32>
    %95 = vector.broadcast %94 : f32 to vector<1x1xf32>
    %96 = vector.extract_strided_slice %49 {offsets = [4, 0], sizes = [4, 1], strides = [1, 1]} : vector<8x1xf32> to vector<4x1xf32>
    %97 = vector.extract_strided_slice %50 {offsets = [4, 0], sizes = [4, 1], strides = [1, 1]} : vector<8x1xf32> to vector<4x1xf32>
    %98 = arith.addf %96, %97 : vector<4x1xf32>
    %99 = vector.shape_cast %98 : vector<4x1xf32> to vector<1x4x1xf32>
    %cst_28 = arith.constant dense<0.000000e+00> : vector<1xf32>
    %100 = vector.multi_reduction <add>, %99, %cst_28 [1, 2] : vector<1x4x1xf32> to vector<1xf32>
    %101 = vector.shape_cast %100 : vector<1xf32> to vector<1x1x1xf32>
    %102 = vector.extract %101[0, 0, 0] : f32 from vector<1x1x1xf32>
    %103 = vector.broadcast %102 : f32 to vector<1x1xf32>
    %104 = arith.mulf %64, %95 : vector<1x1xf32>
    %cst_29 = arith.constant 1.000000e+00 : f32
    %105 = vector.broadcast %cst_29 : f32 to vector<1x1xf32>
    %106 = arith.addf %104, %105 : vector<1x1xf32>
    %cst_30 = arith.constant 2.000000e+00 : f32
    %107 = vector.broadcast %cst_30 : f32 to vector<1x1xf32>
    %108 = arith.mulf %107, %106 : vector<1x1xf32>
    %109 = arith.mulf %64, %103 : vector<1x1xf32>
    %cst_31 = arith.constant 1.000000e+00 : f32
    %110 = vector.broadcast %cst_31 : f32 to vector<1x1xf32>
    %111 = arith.addf %109, %110 : vector<1x1xf32>
    %112 = arith.divf %108, %111 : vector<1x1xf32>
    %113 = arith.addf %89, %112 : vector<1x1xf32>
    %cst_32 = arith.constant 2.000000e+00 : f32
    %114 = vector.broadcast %cst_32 : f32 to vector<1x1xf32>
    %115 = arith.divf %113, %114 : vector<1x1xf32>
    %cst_33 = arith.constant 1.000000e+00 : f32
    %116 = vector.broadcast %cst_33 : f32 to vector<1x1xf32>
    %117 = arith.subf %116, %115 : vector<1x1xf32>
    %cst_34 = arith.constant 1.000000e+00 : f32
    %118 = vector.broadcast %cst_34 : f32 to vector<1x1xf32>
    %119 = arith.mulf %118, %61 : vector<1x1xf32>
    %cst_35 = arith.constant 1.000000e+00 : f32
    %120 = vector.broadcast %cst_35 : f32 to vector<1x1xf32>
    %121 = arith.mulf %120, %117 : vector<1x1xf32>
    %122 = arith.addf %119, %121 : vector<1x1xf32>
    %c0_36 = arith.constant 0 : index
    %c0_37 = arith.constant 0 : index
    %123 = vector.load %arg2[%c0_36, %c0_37] : memref<1x1xf32, #tpu.memory_space<vmem>>, vector<1x1xf32>
    tpu.vector_store %arg2[%c0_36, %c0_37], %122 {strides = array<i32>} : memref<1x1xf32, #tpu.memory_space<vmem>>, vector<1x1xf32>,
    return
  }
}

</mosaic_0001>

<bundles_post_ra>
// kernel: tpu_custom_call.1
= control target key start
LH: loop header
LB: loop body
LE: loop exit
PB: predicated region body
PF: predicated region fallthrough
CT: control target
= control target key end

     0   :  { %7 = vsyncpa [#allocation3], 0  ;;  %s458_s0 = inlined_call_operand.hbm [shape: f32[8,256], index: 0, kind: input, shape index: {}]   ;;  %s459_s1 = inlined_call_operand.hbm [shape: f32[8,256], index: 1, kind: input, shape index: {}]   ;;  %s460_s2 = inlined_call_operand.hbm [shape: f32[1,1], index: 2, kind: output, shape index: {}]  }
   0x1   :  { %8 = vsyncpa [#allocation6], 0 }
   0x2   :  { %9 = vsyncpa [#allocation4], 0  ;;  %s15_s11 = sshll.u32 %s458_s0, 4  ;;  %s410_s12 = smov [#allocation2]   ;;  %s16_s11 = int_to_ptr.hbm [resolvable:$true] %s15_s11 }
   0x3   :  { %s17_s13 = sshll.u32 %s410_s12, 4  ;;  %s26_s16 = sshll.u32 %s459_s1, 4  ;;  %s18_s13 = int_to_ptr.vmem [resolvable:$true] %s17_s13  ;;  %s27_s16 = int_to_ptr.hbm [resolvable:$true] %s26_s16 }
   0x4   :  { %20 = dma.hbm_to_vmem [thread:$0]  %s16_s11, 256, %s18_s13, [#allocation3]  }
   0x5   :  { %s411_s17 = smov [#allocation5]  }
   0x6   :  { %s28_s18 = sshll.u32 %s411_s17, 4  ;;  %s29_s18 = int_to_ptr.vmem [resolvable:$true] %s28_s18 }
   0x7   :  { %31 = dma.hbm_to_vmem [thread:$0]  %s27_s16, 256, %s29_s18, [#allocation6]  }
   0x8   :  { %404 = dma.done.wait [#allocation3], 256  }
   0x9   :  { %405 = vsyncadd [#allocation3], 4294967040 }
   0xa   :  { %406 = dma.done.wait [#allocation6], 256  }
   0xb   :  { %407 = vsyncadd [#allocation6], 4294967040  ;;  %v436_v0 = vld [vmem:[#allocation5] sm:$0xff]  ;;  %v438_v1 = vld [vmem:[#allocation5 + $0x8] sm:$0xff]  ;;  %v412_v58 = vmov 0.0   ;;  %vm130_vm13 = vcmask 7168  }
   0xc   :  { %v40_v2 = vld [vmem:[#allocation2] sm:$0xff]  ;;  %v102_v3 = vadd.f32 %v438_v1, %v436_v0  ;;  %v41_v4 = vld [vmem:[#allocation2 + $0x8] sm:$0xff]  ;;  %vm170_vm14 = vcmask 3072   ;;  %s414_s23 = smov [#allocation7]   ;;  %s283_s27 = sshll.u32 %s460_s2, 4  ;;  %s284_s27 = int_to_ptr.hbm [resolvable:$true] %s283_s27 }
   0xd   :  { %v44_v5 = vand.u32 2147483647, %v40_v2  ;;  %v45_v6 = vand.u32 2147483647, %v41_v4  ;;  %v96_v31 = vmul.f32 %v436_v0, %v40_v2  ;;  %v97_v32 = vmul.f32 %v438_v1, %v41_v4  ;;  %s281_s24 = sshll.u32 %s414_s23, 4  ;;  %s282_s24 = int_to_ptr.vmem [resolvable:$true] %s281_s24 }
   0xe   :  { %103 = vadd.xlane.f32.xlu0 %v102_v3  ;;  %vm88_vm8 = vcmp.ge.f32.partialorder %v40_v2, 0.0  ;;  %v94_v36 = vmax.f32 %v40_v2, 0.0  ;;  %v95_v37 = vmax.f32 %v41_v4, 0.0  ;;  %vm89_vm9 = vcmp.ge.f32.partialorder %v41_v4, 0.0 }
   0xf   :  { %v46_v7 = vsub.f32 0.0, %v44_v5  ;;  %v47_v8 = vsub.f32 0.0, %v45_v6 }
  0x10   :  { %v98_v46 = vsub.f32 %v94_v36, %v96_v31  ;;  %v99_v47 = vsub.f32 %v95_v37, %v97_v32 }
  0x11   :  { %v48_v9 = vmul.f32 1.442695, %v46_v7  ;;  %v50_v10 = vmul.f32 1.442695, %v47_v8 }
  0x13   :  { %312 = vpow2.f32 %v48_v9 }
  0x14   :  { %314 = vpow2.f32 %v50_v10 }
  0x19   :  { %v313_v11 = vpop.eup %312 }
  0x1a   :  { %v315_v12 = vpop.eup %314  ;;  %v52_v13 = vadd.f32 1.0, %v313_v11 }
  0x1b   :  { %v53_v14 = vadd.f32 1.0, %v315_v12 }
  0x1c   :  { %316 = vrcp.f32 %v52_v13  ;;  %vm63_vm0 = vweird.f32 %v52_v13  ;;  %v69_v18 = vand.u32 2147483648, %v52_v13  ;;  %v67_v21 = vand.u32 2147483647, %v52_v13 }
  0x1d   :  { %318 = vrcp.f32 %v53_v14  ;;  %v84_v22 = vand.u32 2147483648, %v53_v14  ;;  %vm78_vm2 = vweird.f32 %v53_v14  ;;  %v82_v24 = vand.u32 2147483647, %v53_v14 }
  0x1e   :  { %320 = vlog2.f32 %v52_v13  ;;  %v70_v26 = vor.u32 1.1754944e-38, %v69_v18  ;;  %vm68_vm5 = vcmp.eq.f32.partialorder %v67_v21, 8.507059e+37 }
  0x1f   :  { %322 = vlog2.f32 %v53_v14  ;;  %v85_v29 = vor.u32 1.1754944e-38, %v84_v22  ;;  %vm83_vm7 = vcmp.eq.f32.partialorder %v82_v24, 8.507059e+37 }
  0x22   :  { %v317_v15 = vpop.eup %316 }
  0x23   :  { %v319_v16 = vpop.eup %318  ;;  %v59_v17 = vmul.f32 %v317_v15, %v52_v13  ;;  %vm64_vm1 = vweird.f32 %v317_v15 }
  0x24   :  { %v74_v19 = vmul.f32 %v319_v16, %v53_v14  ;;  %vm79_vm3 = vweird.f32 %v319_v16  ;;  %vm65_vm4 = vmor %vm63_vm0, %vm64_vm1  ;;  %v321_v38 = vpop.eup %320 }
  0x25   :  { %v60_v20 = vsub.f32 1.0, %v59_v17  ;;  %vm80_vm6 = vmor %vm78_vm2, %vm79_vm3  ;;  %v323_v41 = vpop.eup %322  ;;  %v55_v50 = vmul.f32 0.6931472, %v321_v38 }
  0x26   :  { %v75_v23 = vsub.f32 1.0, %v74_v19  ;;  %v57_v51 = vmul.f32 0.6931472, %v323_v41 }
  0x27   :  { %v61_v25 = vmul.f32 %v317_v15, %v60_v20  ;;  %v100_v53 = vadd.f32 %v98_v46, %v55_v50 }
  0x28   :  { %v76_v27 = vmul.f32 %v319_v16, %v75_v23  ;;  %v101_v54 = vadd.f32 %v99_v47, %v57_v51 }
  0x29   :  { %v62_v28 = vadd.f32 %v317_v15, %v61_v25 }
  0x2a   :  { %v77_v30 = vadd.f32 %v319_v16, %v76_v27  ;;  %v114_v55 = vadd.f32 %v101_v54, %v100_v53 }
  0x2b   :  { %v66_v33 = vsel %vm65_vm4, %v317_v15, %v62_v28 }
  0x2c   :  { %v71_v34 = vsel %vm68_vm5, %v70_v26, %v66_v33  ;;  %v81_v35 = vsel %vm80_vm6, %v319_v16, %v77_v30 }
  0x2d   :  { %v86_v39 = vsel %vm83_vm7, %v85_v29, %v81_v35  ;;  %v90_v40 = vmul.f32 %v313_v11, %v71_v34 }
  0x2e   :  { %v91_v42 = vmul.f32 %v315_v12, %v86_v39 }
  0x2f   :  { %v92_v43 = vsel %vm88_vm8, %v71_v34, %v90_v40 }
  0x30   :  { %v93_v44 = vsel %vm89_vm9, %v86_v39, %v91_v42  ;;  %v119_v45 = vmul.f32 %v92_v43, %v436_v0 }
  0x31   :  { %v125_v48 = vadd.f32 %v93_v44, %v92_v43  ;;  %v120_v49 = vmul.f32 %v93_v44, %v438_v1 }
  0x33   :  { %126 = vadd.xlane.f32.xlu0 %v125_v48  ;;  %v121_v52 = vadd.f32 %v120_v49, %v119_v45 }
  0x35   :  { %122 = vadd.xlane.f32.xlu1 %v121_v52 }
  0x3d   :  { %115 = vadd.xlane.f32.xlu1 %v114_v55 }
  0x81   :  { %v104_v56 = vpop.xlane.xlu0 %103 }
  0x82   :  { %v105_v57 = vmul.f32 0.0003305785, %v104_v56 }
  0x84   :  { %vm106_vm10 = vcmp.ge.f32.partialorder %v105_v57, 0.01  ;;  %vm107_vm11 = vcmp.le.f32.partialorder %v105_v57, 0.99 }
  0x85   :  { %vm108_vm12 = vmand %vm106_vm10, %vm107_vm11 }
  0x86   :  { %v294_v59 = vsel %vm108_vm12, 1.0, %v412_v58  ;;  %vm274_vm12 = vcmask 0  }
  0x87   :  { %v111_v60 = vmul.f32 2.0, %v294_v59 }
  0x89   :  { %v112_v61 = vadd.f32 1.0, %v111_v60 }
  0x8b   :  { %v118_v62 = vmul.f32 256.0, %v112_v61  ;;  %v113_v0 = vmul.f32 %v112_v61, %v112_v61 }
  0x8d   :  { %v131_v63 = vsel %vm130_vm13, %v118_v62, 0.0  ;;  %v129_v2 = vmul.f32 %v113_v0, %v104_v56 }
  0x8e   :  { %132 = vadd.xlane.f32.xlu2 %v131_v63 }
  0xa6   :  { %v127_v1 = vpop.xlane.xlu0 %126 }
  0xa7   :  { %v128_v3 = vmul.f32 %v127_v1, %v113_v0 }
  0xa8   :  { %v123_v4 = vpop.xlane.xlu1 %122 }
  0xa9   :  { %v124_v5 = vmul.f32 %v123_v4, %v113_v0  ;;  %v182_v6 = vadd.f32 %v129_v2, %v128_v3 }
  0xab   :  { %v171_v7 = vsel %vm170_vm14, %v124_v5, 0.0  ;;  %v183_v8 = vsel %vm170_vm14, %v182_v6, 0.0  ;;  %v230_v9 = vrot.slane %v182_v6, 4  ;;  %v216_v14 = vrot.slane %v124_v5, 4 }
  0xac   :  { %172 = vadd.xlane.f32.xlu0 %v171_v7  ;;  %184 = vadd.xlane.f32.xlu1 %v183_v8 }
  0xad   :  { %v232_v12 = vsel %vm170_vm14, %v230_v9, 0.0  ;;  %v218_v15 = vsel %vm170_vm14, %v216_v14, 0.0 }
  0xb0   :  { %v116_v10 = vpop.xlane.xlu1 %115 }
  0xb1   :  { %v117_v11 = vmul.f32 %v116_v10, %v112_v61  ;;  %v413_v10 = vmov 2.0  }
  0xb3   :  { %v142_v13 = vsel %vm130_vm13, %v117_v11, 0.0 }
  0xb4   :  { %233 = vadd.xlane.f32.xlu0 %v232_v12  ;;  %143 = vadd.xlane.f32.xlu2 %v142_v13 }
  0xbc   :  { %219 = vadd.xlane.f32.xlu2 %v218_v15 }
 0x101   :  { %v133_v16 = vpop.xlane.xlu2 %132 }
 0x102   :  { %v134_v17 = vrot.slane %v133_v16, 4 }
 0x104   :  { %v135_v18 = vadd.f32 %v134_v17, %v133_v16 }
 0x106   :  { %v136_v19 = vrot.slane %v135_v18, 2 }
 0x108   :  { %v137_v20 = vadd.f32 %v136_v19, %v135_v18 }
 0x10a   :  { %v138_v21 = vrot.slane %v137_v20, 1 }
 0x10c   :  { %v139_v22 = vadd.f32 %v138_v21, %v137_v20 }
 0x10e   :  { %295 = vpush %v139_v22 }
 0x11f   :  { %v173_v23 = vpop.xlane.xlu0 %172  ;;  %v185_v24 = vpop.xlane.xlu1 %184 }
 0x120   :  { %v174_v25 = vrot.slane %v173_v23, 4  ;;  %v186_v26 = vrot.slane %v185_v24, 4 }
 0x122   :  { %v175_v27 = vadd.f32 %v174_v25, %v173_v23  ;;  %v187_v28 = vadd.f32 %v186_v26, %v185_v24 }
 0x124   :  { %v176_v29 = vrot.slane %v175_v27, 2  ;;  %v188_v32 = vrot.slane %v187_v28, 2 }
 0x126   :  { %v177_v37 = vadd.f32 %v176_v29, %v175_v27  ;;  %v189_v38 = vadd.f32 %v188_v32, %v187_v28 }
 0x127   :  { %v234_v30 = vpop.xlane.xlu0 %233  ;;  %v144_v31 = vpop.xlane.xlu2 %143 }
 0x128   :  { %v235_v33 = vrot.slane %v234_v30, 4  ;;  %v145_v34 = vrot.slane %v144_v31, 4  ;;  %v178_v43 = vrot.slane %v177_v37, 1  ;;  %v190_v46 = vrot.slane %v189_v38, 1 }
 0x12a   :  { %v146_v35 = vadd.f32 %v145_v34, %v144_v31  ;;  %v236_v36 = vadd.f32 %v235_v33, %v234_v30  ;;  %v179_v50 = vadd.f32 %v178_v43, %v177_v37  ;;  %v191_v52 = vadd.f32 %v190_v46, %v189_v38 }
 0x12c   :  { %v147_v39 = vrot.slane %v146_v35, 2  ;;  %v237_v41 = vrot.slane %v236_v36, 2 }
 0x12e   :  { %v148_v40 = vadd.f32 %v147_v39, %v146_v35  ;;  %v238_v49 = vadd.f32 %v237_v41, %v236_v36 }
 0x12f   :  { %v220_v42 = vpop.xlane.xlu2 %219 }
 0x130   :  { %v221_v44 = vrot.slane %v220_v42, 4  ;;  %v149_v45 = vrot.slane %v148_v40, 1  ;;  %v239_v54 = vrot.slane %v238_v49, 1 }
 0x132   :  { %v222_v47 = vadd.f32 %v221_v44, %v220_v42  ;;  %v150_v48 = vadd.f32 %v149_v45, %v148_v40  ;;  %v240_v57 = vadd.f32 %v239_v54, %v238_v49 }
 0x134   :  { %v223_v51 = vrot.slane %v222_v47, 2  ;;  %297 = vpush %v150_v48 }
 0x135   :  { %299 = vpush %v179_v50 }
 0x136   :  { %v224_v53 = vadd.f32 %v223_v51, %v222_v47  ;;  %301 = vpush %v191_v52 }
 0x138   :  { %v225_v55 = vrot.slane %v224_v53, 1 }
 0x13a   :  { %v226_v56 = vadd.f32 %v225_v55, %v224_v53 }
 0x13c   :  { %303 = vpush %v226_v56 }
 0x13d   :  { %305 = vpush %v240_v57 }
 0x13f   :  { %s296_s0 = spop %295 }
 0x140   :  { %v141_v58 = vstv %s296_s0 }
 0x141   :  { %324 = vrcp.f32 %v141_v58  ;;  %vm158_vm15 = vweird.f32 %v141_v58  ;;  %v164_v63 = vand.u32 2147483648, %v141_v58  ;;  %v162_v1 = vand.u32 2147483647, %v141_v58 }
 0x142   :  { %326 = vrcp.f32 %v413_v10 }
 0x143   :  { %v165_v2 = vor.u32 1.1754944e-38, %v164_v63  ;;  %vm163_vm2 = vcmp.eq.f32.partialorder %v162_v1, 8.507059e+37 }
 0x147   :  { %v325_v59 = vpop.eup %324 }
 0x148   :  { %v154_v60 = vmul.f32 %v325_v59, %v141_v58  ;;  %vm159_vm0 = vweird.f32 %v325_v59  ;;  %v327_v13 = vpop.eup %326 }
 0x149   :  { %vm160_vm1 = vmor %vm158_vm15, %vm159_vm0  ;;  %v265_v18 = vmul.f32 2.0, %v327_v13  ;;  %vm269_vm10 = vweird.f32 %v327_v13 }
 0x14a   :  { %v155_v61 = vsub.f32 1.0, %v154_v60 }
 0x14b   :  { %v266_v25 = vsub.f32 1.0, %v265_v18 }
 0x14c   :  { %v156_v62 = vmul.f32 %v325_v59, %v155_v61 }
 0x14d   :  { %v267_v34 = vmul.f32 %v327_v13, %v266_v25 }
 0x14e   :  { %v157_v0 = vadd.f32 %v325_v59, %v156_v62 }
 0x14f   :  { %v268_v42 = vadd.f32 %v327_v13, %v267_v34 }
 0x150   :  { %v161_v3 = vsel %vm160_vm1, %v325_v59, %v157_v0 }
 0x151   :  { %v448_v4 = vsel %vm163_vm2, %v165_v2, %v161_v3  ;;  %v270_v49 = vsel %vm269_vm10, %v327_v13, %v268_v42 }
 0x152   :  { %v168_v5 = vmul.f32 2048.0, %v448_v4 }
 0x154   :  { %v169_v6 = vmul.f32 %v168_v5, %v168_v5 }
 0x165   :  { %s451_s1 = spop %297 }
 0x166   :  { %s300_s19 = spop %299  ;;  %v152_v51 = vstv %s451_s1 }
 0x167   :  { %s302_s20 = spop %301  ;;  %v181_v19 = vstv %s300_s19  ;;  %v167_v53 = vmul.f32 %v448_v4, %v152_v51 }
 0x168   :  { %v193_v7 = vstv %s302_s20  ;;  %v194_v23 = vmul.f32 %v181_v19, %v169_v6 }
 0x169   :  { %v197_v8 = vmul.f32 %v193_v7, %v169_v6 }
 0x16a   :  { %v195_v31 = vadd.f32 1.0, %v194_v23 }
 0x16b   :  { %v198_v9 = vadd.f32 1.0, %v197_v8 }
 0x16c   :  { %v196_v43 = vmul.f32 2.0, %v195_v31 }
 0x16d   :  { %328 = vrcp.f32 %v198_v9  ;;  %s304_s21 = spop %303  ;;  %v210_v28 = vand.u32 2147483648, %v198_v9  ;;  %vm204_vm4 = vweird.f32 %v198_v9  ;;  %v208_v29 = vand.u32 2147483647, %v198_v9 }
 0x16e   :  { %s306_s22 = spop %305  ;;  %v228_v20 = vstv %s304_s21 }
 0x16f   :  { %v242_v11 = vstv %s306_s22  ;;  %v243_v24 = vmul.f32 %v228_v20, %v169_v6  ;;  %v211_v38 = vor.u32 1.1754944e-38, %v210_v28  ;;  %vm209_vm7 = vcmp.eq.f32.partialorder %v208_v29, 8.507059e+37 }
 0x170   :  { %v246_v12 = vmul.f32 %v242_v11, %v169_v6 }
 0x171   :  { %v244_v32 = vadd.f32 1.0, %v243_v24 }
 0x172   :  { %v247_v14 = vadd.f32 1.0, %v246_v12 }
 0x173   :  { %v329_v15 = vpop.eup %328  ;;  %v245_v44 = vmul.f32 2.0, %v244_v32 }
 0x174   :  { %v200_v16 = vmul.f32 %v329_v15, %v198_v9  ;;  %330 = vrcp.f32 %v247_v14  ;;  %vm205_vm3 = vweird.f32 %v329_v15  ;;  %v259_v33 = vand.u32 2147483648, %v247_v14 }
 0x175   :  { %vm206_vm5 = vmor %vm204_vm4, %vm205_vm3  ;;  %v257_v36 = vand.u32 2147483647, %v247_v14  ;;  %vm253_vm8 = vweird.f32 %v247_v14 }
 0x176   :  { %v201_v17 = vsub.f32 1.0, %v200_v16  ;;  %v260_v40 = vor.u32 1.1754944e-38, %v259_v33 }
 0x177   :  { %vm258_vm11 = vcmp.eq.f32.partialorder %v257_v36, 8.507059e+37 }
 0x178   :  { %v202_v21 = vmul.f32 %v329_v15, %v201_v17 }
 0x17a   :  { %v331_v22 = vpop.eup %330  ;;  %v203_v26 = vadd.f32 %v329_v15, %v202_v21 }
 0x17b   :  { %v249_v27 = vmul.f32 %v331_v22, %v247_v14  ;;  %vm254_vm6 = vweird.f32 %v331_v22 }
 0x17c   :  { %v207_v37 = vsel %vm206_vm5, %v329_v15, %v203_v26  ;;  %vm255_vm9 = vmor %vm253_vm8, %vm254_vm6 }
 0x17d   :  { %v250_v30 = vsub.f32 1.0, %v249_v27  ;;  %v212_v41 = vsel %vm209_vm7, %v211_v38, %v207_v37 }
 0x17e   :  { %v213_v47 = vmul.f32 %v212_v41, %v196_v43 }
 0x17f   :  { %v251_v35 = vmul.f32 %v331_v22, %v250_v30 }
 0x181   :  { %v252_v39 = vadd.f32 %v331_v22, %v251_v35 }
 0x183   :  { %v256_v45 = vsel %vm255_vm9, %v331_v22, %v252_v39 }
 0x184   :  { %v261_v46 = vsel %vm258_vm11, %v260_v40, %v256_v45 }
 0x185   :  { %v262_v48 = vmul.f32 %v261_v46, %v245_v44 }
 0x187   :  { %v263_v50 = vadd.f32 %v262_v48, %v213_v47 }
 0x189   :  { %v271_v52 = vmul.f32 %v270_v49, %v263_v50 }
 0x18b   :  { %v272_v54 = vsub.f32 1.0, %v271_v52 }
 0x18d   :  { %v273_v55 = vadd.f32 %v272_v54, %v167_v53 }
 0x18f   :  { %275 = vst.msk [vmem:[#allocation7] sm:$0x1] %vm274_vm12, %v273_v55 }
 0x190   :  { %286 = dma.vmem_to_hbm [thread:$0]  %s282_s24, 16, %s284_s27, [#allocation4]  }
 0x191   :  { %408 = dma.done.wait [#allocation4], 16  }
 0x192   :  { %409 = vsyncadd [#allocation4], 4294967280 }
 0x193   :  { %291 = vsyncpa [#allocation3], 1 }
 0x194   :  { %292 = vsyncpa [#allocation6], 1 }
 0x195   :  { %293 = vsyncpa [#allocation4], 1 }

</bundles_post_ra>
